<compile_context>
chip_gen: v7x
topology: tpu7x:2x2x1
jax: 0.10.0
libtpu: 0.0.40
codegen_flags: <defaults>
</compile_context>

<pallas_src>
import functools

import jax
import jax.numpy as jnp
import numpy as np
from jax.experimental import pallas as pl
from jax.experimental.pallas import tpu as pltpu


_LANE = 128
_P_BYTES_CAP = 4 * 1024 * 1024      # absolute cap on the pooling matrix
_MXU_SAFE_FRACTION = 0.7            # keep MXU estimate under 70% of HBM time


def _pool_matmul_kernel(x_ref, p_ref, o_ref, *, precision):
    # One MXU matmul per grid step: (Bm, Lin) @ (Lin, Lout) -> (Bm, Lout).
    # P has a constant index_map and stays resident in VMEM.
    o_ref[...] = jnp.dot(
        x_ref[...], p_ref[...],
        precision=precision,
        preferred_element_type=jnp.float32,
    ).astype(o_ref.dtype)


@functools.lru_cache(maxsize=None)
def _chip_params():
    """Rough per-TensorCore roofline numbers: (bf16 MACs/s, HBM B/s, VMEM bytes)."""
    kind = ""
    try:
        kind = jax.devices()[0].device_kind.lower()
    except Exception:
        pass
    if "v7" in kind:
        macs, bw, vmem = 498e12, 3.2e12, 64 << 20
    elif "v6" in kind:
        macs, bw, vmem = 459e12, 1.35e12, 128 << 20
    elif "v5" in kind:                      # v5e/v5p: conservative v5e numbers
        macs, bw, vmem = 98e12, 8.2e11, 128 << 20
    else:                                   # unknown: weak MXU, small VMEM
        macs, bw, vmem = 98e12, 8.2e11, 64 << 20
    try:
        vmem = int(pltpu.get_tpu_info().vmem_capacity_bytes)
    except Exception:
        pass
    return macs, bw, vmem


def _sublane_rows(dtype):
    """Sublane packing of the dtype: 8 for f32, 16 for bf16, 32 for int8/fp8."""
    return max(8, 32 // max(1, jnp.dtype(dtype).itemsize))


@functools.lru_cache(maxsize=None)
def _pool_matrix_np(base_rows, W, layer_type, g):
    """Pooling matrix for a chunk of `base_rows` image rows of width W.

    Shape (base_rows*W, (base_rows//2)*ncol), f32, such that for a flattened
    chunk x of `base_rows` rows, x @ P is the avg-pooled chunk:
      'timepreserve': ncol = W,        weight 0.5  (pool over row pairs)
      'half'        : ncol = (W+1)//2, weight 0.25 (2x2 pool; odd W -> last
                      column "replicated", i.e. weight 0.5 on w == W-1)
    Odd base_rows: the last row gets weight 0 (avg_pool2d floor behaviour).
    g > 1 packs g consecutive chunks per matmul row (block-diagonal kron).
    """
    ncol = W if layer_type == 'timepreserve' else (W + 1) // 2
    n_out = (base_rows // 2) * ncol
    h = np.arange(base_rows * W) // W
    w = np.arange(base_rows * W) % W
    if layer_type == 'timepreserve':
        col = (h // 2) * ncol + w
        wt = np.full(base_rows * W, 0.5, np.float32)
    else:
        col = (h // 2) * ncol + (w // 2)
        wt = np.full(base_rows * W, 0.25, np.float32)
        if W % 2 == 1:
            wt[w == W - 1] = 0.5          # replicated last column -> 0.25 * 2
    p = np.zeros((base_rows * W, n_out), np.float32)
    valid = (h // 2) < (base_rows // 2)    # floor mode: drop last row if odd
    p[np.arange(base_rows * W)[valid], col[valid]] = wt[valid]
    if g > 1:
        p = np.kron(np.eye(g, dtype=np.float32), p)
    return p


def _choose_chunk_rows(H, W, n_planes, layer_type, itemsize,
                       macs_per_sec, hbm_bw, p_byte_cap):
    """Image rows packed per matmul row (defines Lin = r*W and Lout).

    Roofline-aware: only grow r towards a lane-dense (>=128) output while the
    MXU estimate stays well under the HBM estimate and P stays a small share
    of the total traffic.  Returns None if no legal chunk fits the P cap.
    """
    ncol = W if layer_type == 'timepreserve' else (W + 1) // 2
    cands = set()
    if H % 2 == 0:
        # Sub-plane chunks: even divisors of H (row pairs never straddle chunks).
        cands.update(d for d in range(2, H + 1, 2) if H % d == 0)
    # Whole planes / groups of consecutive planes (only legal option for odd H).
    cands.update(H * g for g in range(1, n_planes + 1) if n_planes % g == 0)
    cands = sorted(cands)

    total_elems = n_planes * H * W
    total_bytes = total_elems * itemsize
    out_bytes = n_planes * (H // 2) * ncol * itemsize

    def lout_of(r):
        if r >= H:                                 # whole-plane groups
            return (r // H) * (H // 2) * ncol
        return (r // 2) * ncol

    def p_bytes(r):
        return r * W * lout_of(r) * itemsize

    affordable = [r for r in cands if p_bytes(r) <= p_byte_cap]
    if not affordable:
        return None

    # The (read-once) pooling matrix must stay a small share of HBM traffic.
    p_traffic_cap = max(256 << 10, total_bytes // 4)

    def mxu_time(r):       # m * Lin * Lout MACs == total_elems * Lout
        return total_elems * lout_of(r) / macs_per_sec

    def hbm_time(r):
        return (total_bytes + out_bytes + p_bytes(r)) / hbm_bw

    best = affordable[0]                           # minimal MXU work by default
    for r in affordable:                           # ascending
        if mxu_time(r) > _MXU_SAFE_FRACTION * hbm_time(r):
            break                                  # larger r only adds MXU work
        if p_bytes(r) > p_traffic_cap:
            break
        best = r                                   # largest r that stays HBM-bound
        if lout_of(r) >= _LANE:
            break                                  # lane-dense output reached
    return best


def _choose_block_rows(m, row_bytes, per_copy_budget, sublane):
    """Rows of the (M, Lin) view per grid step.

    Sublane-aligned, fits the per-copy VMEM budget (blocks are double
    buffered), and produces an even number of near-equal blocks so both v7x
    TensorCores get balanced work under dimension_semantics=("parallel",).
    """
    max_rows = max(sublane, (per_copy_budget // row_bytes) // sublane * sublane)
    if m <= 2 * sublane:
        return m                                   # tiny problem: one full block
    g = 2
    while True:
        per = -(-m // g)                           # ceil(m / g)
        bm = -(-per // sublane) * sublane          # round up to sublane multiple
        if bm <= max_rows or bm <= sublane:
            return bm
        g += 2


def _xla_pool(x, layer_type):
    """Plain-XLA fallback, only used for pathological shapes (P won't fit VMEM)."""
    N, C, H, W = x.shape
    if layer_type == 'half' and W % 2 != 0:
        x = jnp.concatenate([x, x[..., -1:]], axis=-1)
    W2 = x.shape[-1]
    x = x[:, :, :2 * (H // 2), :]
    if layer_type == 'timepreserve':
        return x.reshape(N, C, H // 2, 2, W2).mean(axis=3)
    return x.reshape(N, C, H // 2, 2, W2 // 2, 2).mean(axis=(3, 5))


def downsample(x, layer_type):
    """JAX/Pallas equivalent of DownSample(layer_type)(x) for NCHW inputs."""
    if layer_type == 'none':
        return x
    if layer_type not in ('timepreserve', 'half'):
        raise RuntimeError(
            'Got unexpected donwsampletype %s, expected is [none, timepreserve, half]'
            % layer_type)

    N, C, H, W = x.shape
    dtype = x.dtype
    itemsize = jnp.dtype(dtype).itemsize
    Ho = H // 2
    Wo = W if layer_type == 'timepreserve' else (W + 1) // 2
    n_planes = N * C

    macs_rate, hbm_bw, vmem_cap = _chip_params()
    if itemsize >= 4:
        macs_rate = macs_rate / 4.0          # f32 runs at ~1/4 of the bf16 MXU rate
    vmem_limit = int(vmem_cap * 0.70)        # scoped-VMEM limit with headroom
    p_cap = min(_P_BYTES_CAP, vmem_limit // 8)

    r = _choose_chunk_rows(H, W, n_planes, layer_type, itemsize,
                           macs_rate, hbm_bw, p_cap)
    if r is None:
        # TODO(synk): factorized H-pool (VPU add) + (W, Wo) matmul kernel for very
        # wide W / huge odd-H planes; dense P is O(W^2) and would blow VMEM here.
        return _xla_pool(x, layer_type)

    if r >= H:
        p_np = _pool_matrix_np(H, W, layer_type, r // H)   # whole plane(s) per row
    else:
        p_np = _pool_matrix_np(r, W, layer_type, 1)        # sub-plane chunks (H even)
    p = jnp.asarray(p_np, dtype=dtype)                     # 0.5/0.25 exact in bf16/f32
    lin, lout = p.shape

    m = (n_planes * H * W) // lin
    x2 = x.reshape(m, lin)                                 # free row-major reshape

    sublane = _sublane_rows(dtype)
    p_nbytes = lin * lout * itemsize
    # Live VMEM ~= 2 * Bm*(Lin+Lout)*itemsize  +  (1 or 2) * P.  Budget against
    # 80% of the scoped limit, assuming the worst case of 2 P copies.
    budget = max(1 << 20, int(vmem_limit * 0.8) - 2 * p_nbytes)
    per_copy = max(1 << 20, budget // 2)
    bm = _choose_block_rows(m, (lin + lout) * itemsize, per_copy, sublane)
    grid = (pl.cdiv(m, bm),)

    cost = pl.CostEstimate(
        flops=2 * m * lin * lout,
        transcendentals=0,
        bytes_accessed=(m * lin + lin * lout + m * lout) * itemsize,
    )
    precision = (jax.lax.Precision.HIGHEST
                 if jnp.dtype(dtype) == jnp.dtype(jnp.float32) else None)

    def _call(buffered_p, prec):
        p_spec_kwargs = {"pipeline_mode": pl.Buffered(1)} if buffered_p else {}
        return pl.pallas_call(
            functools.partial(_pool_matmul_kernel, precision=prec),
            out_shape=jax.ShapeDtypeStruct((m, lout), dtype),
            grid=grid,
            in_specs=[
                pl.BlockSpec((bm, lin), lambda i: (i, 0)),
                # Constant index_map -> fetched once, stays resident in VMEM.
                pl.BlockSpec((lin, lout), lambda i: (0, 0), **p_spec_kwargs),
            ],
            out_specs=pl.BlockSpec((bm, lout), lambda i: (i, 0)),
            compiler_params=pltpu.CompilerParams(
                dimension_semantics=("parallel",),
                vmem_limit_bytes=vmem_limit,
            ),
            cost_estimate=cost,
        )(x2, p)

    try:
        out2 = _call(True, precision)
    except Exception:
        # Fallback without the optional features (single-buffered P / HIGHEST
        # precision) in case the local JAX version rejects either.
        out2 = _call(False, None)
    return out2.reshape(N, C, Ho, Wo)


# ----------------------------- references (test only) -----------------------------

def _ref_timepreserve(x):
    N, C, H, W = x.shape
    return x[:, :, :2 * (H // 2), :].reshape(N, C, H // 2, 2, W).mean(axis=3)


def _ref_half(x):
    N, C, H, W = x.shape
    if W % 2 != 0:
        x = jnp.concatenate([x, x[..., -1:]], axis=-1)
    W2 = x.shape[-1]
    return x[:, :, :2 * (H // 2), :].reshape(
        N, C, H // 2, 2, W2 // 2, 2).mean(axis=(3, 5))


if __name__ == "__main__":
    key = jax.random.PRNGKey(0)
    k1, k2, k3, k4 = jax.random.split(key, 4)

    # Small shapes consistent with the module's use in the discriminator.
    x_even = jax.random.normal(k1, (2, 4, 16, 16), dtype=jnp.float32)
    x_odd_w = jax.random.normal(k2, (2, 4, 16, 15), dtype=jnp.float32)   # odd width
    x_odd_h = jax.random.normal(k3, (2, 3, 9, 16), dtype=jnp.float32)    # odd height
    # Larger shape exercising sub-plane chunking and a multi-step balanced grid.
    x_big = jax.random.normal(k4, (4, 32, 80, 192), dtype=jnp.float32)

    # none
    y = jax.block_until_ready(downsample(x_even, 'none'))
    assert y.shape == x_even.shape and bool(jnp.all(y == x_even))

    # timepreserve
    y = jax.block_until_ready(downsample(x_even, 'timepreserve'))
    assert y.shape == (2, 4, 8, 16)
    assert jnp.allclose(y, _ref_timepreserve(x_even), atol=1e-5, rtol=1e-5)

    # half, odd width (replicated last column folded into P, no concatenate)
    y = jax.block_until_ready(downsample(x_odd_w, 'half'))
    assert y.shape == (2, 4, 8, 8)
    assert jnp.allclose(y, _ref_half(x_odd_w), atol=1e-5, rtol=1e-5)

    # half, even width
    y = jax.block_until_ready(downsample(x_even, 'half'))
    assert y.shape == (2, 4, 8, 8)
    assert jnp.allclose(y, _ref_half(x_even), atol=1e-5, rtol=1e-5)

    # odd height (floor behaviour of avg_pool2d, whole-plane chunks)
    y = jax.block_until_ready(downsample(x_odd_h, 'timepreserve'))
    assert y.shape == (2, 3, 4, 16)
    assert jnp.allclose(y, _ref_timepreserve(x_odd_h), atol=1e-5, rtol=1e-5)
    y = jax.block_until_ready(downsample(x_odd_h, 'half'))
    assert y.shape == (2, 3, 4, 8)
    assert jnp.allclose(y, _ref_half(x_odd_h), atol=1e-5, rtol=1e-5)

    # larger shapes (real discriminator regime: many planes, multi-block grid)
    y = jax.block_until_ready(downsample(x_big, 'timepreserve'))
    assert y.shape == (4, 32, 40, 192)
    assert jnp.allclose(y, _ref_timepreserve(x_big), atol=1e-5, rtol=1e-5)

    y = jax.block_until_ready(downsample(x_big, 'half'))
    assert y.shape == (4, 32, 40, 96)
    assert jnp.allclose(y, _ref_half(x_big), atol=1e-5, rtol=1e-5)

    print("KERNEL_OK")
</pallas_src>

<mosaic_0001>
module attributes {stable_mosaic.version = 11 : i64} {
  func.func @_pool_matmul_kernel(%arg0: i32, %arg1: memref<8x256xf32, #tpu.memory_space<vmem>>, %arg2: memref<256x128xf32, #tpu.memory_space<vmem>>, %arg3: memref<8x128xf32, #tpu.memory_space<vmem>>) attributes {dimension_semantics = [#tpu.dimension_semantics<parallel>], iteration_bounds = array<i64: 1>, scalar_prefetch = 0 : i64, scratch_operands = 0 : i64, tpu.core_type = #tpu.core_type<tc>, window_params = [{transform_indices = @transform_0, window_bounds = array<i64: 8, 256>}, {pipeline_mode = #tpu.pipeline_mode<synchronous>, transform_indices = @transform_1, window_bounds = array<i64: 256, 128>}, {transform_indices = @transform_2, window_bounds = array<i64: 8, 128>}]} {
    %c0 = arith.constant 0 : index
    %c0_0 = arith.constant 0 : index
    %0 = vector.load %arg1[%c0, %c0_0] : memref<8x256xf32, #tpu.memory_space<vmem>>, vector<8x256xf32>
    %c0_1 = arith.constant 0 : index
    %c0_2 = arith.constant 0 : index
    %1 = vector.load %arg2[%c0_1, %c0_2] : memref<256x128xf32, #tpu.memory_space<vmem>>, vector<256x128xf32>
    %cst = arith.constant dense<0.000000e+00> : vector<8x128xf32>
    %2 = tpu.matmul %0, %1, %cst {dimension_numbers = #tpu.dot_dimension_numbers<[1], [0], [0], [1], [0, 0, 1, 1], [], []>, precision = #tpu.contract_precision<fp32>} : vector<8x256xf32>, vector<256x128xf32>, vector<8x128xf32> -> vector<8x128xf32>
    %c0_3 = arith.constant 0 : index
    %c0_4 = arith.constant 0 : index
    %3 = vector.load %arg3[%c0_3, %c0_4] : memref<8x128xf32, #tpu.memory_space<vmem>>, vector<8x128xf32>
    tpu.vector_store %arg3[%c0_3, %c0_4], %2 {strides = array<i32>} : memref<8x128xf32, #tpu.memory_space<vmem>>, vector<8x128xf32>,
    return
  }
  func.func @transform_0(%arg0: i32) -> (i32, i32) {
    %c0_i32 = arith.constant 0 : i32
    %c0_i32_0 = arith.constant 0 : i32
    return %arg0, %c0_i32 : i32, i32
  }
  func.func @transform_1(%arg0: i32) -> (i32, i32) {
    %c0_i32 = arith.constant 0 : i32
    %c0_i32_0 = arith.constant 0 : i32
    %c0_i32_1 = arith.constant 0 : i32
    return %c0_i32, %c0_i32_0 : i32, i32
  }
  func.func @transform_2(%arg0: i32) -> (i32, i32) {
    %c0_i32 = arith.constant 0 : i32
    %c0_i32_0 = arith.constant 0 : i32
    return %arg0, %c0_i32 : i32, i32
  }
}

module attributes {stable_mosaic.version = 11 : i64} {
  func.func @_pool_matmul_kernel(%arg0: i32, %arg1: memref<8x256xf32, #tpu.memory_space<vmem>>, %arg2: memref<256x128xf32, #tpu.memory_space<vmem>>, %arg3: memref<8x128xf32, #tpu.memory_space<vmem>>) attributes {dimension_semantics = [#tpu.dimension_semantics<parallel>], iteration_bounds = array<i64: 1>, scalar_prefetch = 0 : i64, scratch_operands = 0 : i64, tpu.core_type = #tpu.core_type<tc>, window_params = [{transform_indices = @transform_0, window_bounds = array<i64: 8, 256>}, {pipeline_mode = #tpu.pipeline_mode<synchronous>, transform_indices = @transform_1, window_bounds = array<i64: 256, 128>}, {transform_indices = @transform_2, window_bounds = array<i64: 8, 128>}]} {
    %c0 = arith.constant 0 : index
    %c0_0 = arith.constant 0 : index
    %0 = vector.load %arg1[%c0, %c0_0] : memref<8x256xf32, #tpu.memory_space<vmem>>, vector<8x256xf32>
    %c0_1 = arith.constant 0 : index
    %c0_2 = arith.constant 0 : index
    %1 = vector.load %arg2[%c0_1, %c0_2] : memref<256x128xf32, #tpu.memory_space<vmem>>, vector<256x128xf32>
    %cst = arith.constant dense<0.000000e+00> : vector<8x128xf32>
    %2 = tpu.matmul %0, %1, %cst {dimension_numbers = #tpu.dot_dimension_numbers<[1], [0], [0], [1], [0, 0, 1, 1], [], []>} : vector<8x256xf32>, vector<256x128xf32>, vector<8x128xf32> -> vector<8x128xf32>
    %c0_3 = arith.constant 0 : index
    %c0_4 = arith.constant 0 : index
    %3 = vector.load %arg3[%c0_3, %c0_4] : memref<8x128xf32, #tpu.memory_space<vmem>>, vector<8x128xf32>
    tpu.vector_store %arg3[%c0_3, %c0_4], %2 {strides = array<i32>} : memref<8x128xf32, #tpu.memory_space<vmem>>, vector<8x128xf32>,
    return
  }
  func.func @transform_0(%arg0: i32) -> (i32, i32) {
    %c0_i32 = arith.constant 0 : i32
    %c0_i32_0 = arith.constant 0 : i32
    return %arg0, %c0_i32 : i32, i32
  }
  func.func @transform_1(%arg0: i32) -> (i32, i32) {
    %c0_i32 = arith.constant 0 : i32
    %c0_i32_0 = arith.constant 0 : i32
    %c0_i32_1 = arith.constant 0 : i32
    return %c0_i32, %c0_i32_0 : i32, i32
  }
  func.func @transform_2(%arg0: i32) -> (i32, i32) {
    %c0_i32 = arith.constant 0 : i32
    %c0_i32_0 = arith.constant 0 : i32
    return %arg0, %c0_i32 : i32, i32
  }
}

</mosaic_0001>

<bundles_post_ra>
// kernel: tpu_custom_call.1
= control target key start
LH: loop header
LB: loop body
LE: loop exit
PB: predicated region body
PF: predicated region fallthrough
CT: control target
= control target key end

     0   :  { %7 = vsyncpa [#allocation3], 0  ;;  %s1891_s0 = inlined_call_operand.hbm [shape: f32[8,256], index: 0, kind: input, shape index: {}]   ;;  %s1892_s1 = inlined_call_operand.hbm [shape: f32[256,128], index: 1, kind: input, shape index: {}]   ;;  %s1893_s2 = inlined_call_operand.hbm [shape: f32[8,128], index: 2, kind: output, shape index: {}]  }
   0x1   :  { %8 = vsyncpa [#allocation6], 0 }
   0x2   :  { %9 = vsyncpa [#allocation4], 0  ;;  %s1430_s9 = smov [#allocation2]   ;;  %s1431_s11 = smov [#allocation5]  }
   0x3   :  { %s16_s10 = sshll.u32 %s1430_s9, 4  ;;  %s25_s12 = sshll.u32 %s1431_s11, 4  ;;  %s17_s10 = int_to_ptr.vmem [resolvable:$true] %s16_s10  ;;  %s1450_s12 = int_to_ptr.vmem [resolvable:$true] %s25_s12 }
   0x4   :  { %s1358_s15 = scalar_lea.hbm %s1891_s0, 256 }
   0x5   :  { %p1359_p0 = scmp.ne.s32.totalorder %s1891_s0, %s1358_s15  ;;  %p1362_p1 = scmp.lt.u32.totalorder %s1358_s15, %s1891_s0 }
   0x7   :  { %p1364_p2 = pnand %p1362_p1, %p1359_p0 }
   0x9   :  { %1367 = shalt.err (!%p1364_p2)
}
   0xa   :  { %s1368_s20 = scalar_lea.vmem %s17_s10, 256  ;;  %p1373_p4 = scmp.lt.s32.totalorder %s17_s10, %s17_s10 }
   0xb   :  { %p1369_p3 = scmp.ne.s32.totalorder %s17_s10, %s1368_s20  ;;  %p1374_p5 = scmp.lt.s32.totalorder %s1368_s20, %s1368_s20 }
   0xd   :  { %p1375_p6 = por %p1374_p5, %p1373_p4 }
   0xf   :  { %p1376_p7 = pnand %p1375_p6, %p1369_p3 }
  0x11   :  { %1379 = shalt.err (!%p1376_p7)
}
  0x12   :  { %19 = dma.hbm_to_vmem [thread:$0]  %s1891_s0, 256, %s17_s10, [#allocation3]  }
  0x13   :  { %s1380_s25 = scalar_lea.hbm %s1892_s1, 4096 }
  0x14   :  { %p1381_p8 = scmp.ne.s32.totalorder %s1892_s1, %s1380_s25  ;;  %p1384_p9 = scmp.lt.u32.totalorder %s1380_s25, %s1892_s1 }
  0x16   :  { %p1386_p10 = pnand %p1384_p9, %p1381_p8 }
  0x18   :  { %1389 = shalt.err (!%p1386_p10)
}
  0x19   :  { %s1390_s30 = scalar_lea.vmem %s1450_s12, 4096  ;;  %p1395_p12 = scmp.lt.s32.totalorder %s1450_s12, %s1450_s12 }
  0x1a   :  { %p1391_p11 = scmp.ne.s32.totalorder %s1450_s12, %s1390_s30  ;;  %p1396_p13 = scmp.lt.s32.totalorder %s1390_s30, %s1390_s30 }
  0x1c   :  { %p1397_p0 = por %p1396_p13, %p1395_p12 }
  0x1e   :  { %p1398_p1 = pnand %p1397_p0, %p1391_p11 }
  0x20   :  { %1401 = shalt.err (!%p1398_p1)
}
  0x21   :  { %s1432_s0 = smov 128   ;;  %s1433_s3 = smov 8  }
  0x22   :  { %31 = dma.hbm_to_vmem [thread:$0]  %s1892_s1, 4096, %s1450_s12, [#allocation6], %s1432_s0, %s1432_s0, %s1433_s3  }
  0x23   :  { %1424 = dma.done.wait [#allocation3], 256  }
  0x24   :  { %1425 = vsyncadd [#allocation3], 4294967040 }
  0x25   :  { %1426 = dma.done.wait [#allocation6], 4096  }
  0x26   :  { %1427 = vsyncadd [#allocation6], 4294963200  ;;  %v56_v0 = vld [vmem:[#allocation5 + $0x80] sm:$0xff]  ;;  %v57_v1 = vld [vmem:[#allocation5 + $0x88] sm:$0xff]  ;;  %s1434_s1 = smov [#allocation7]  }
  0x27   :  { %v40_v2 = vld [vmem:[#allocation5] sm:$0xff]  ;;  %v121_v3 = vand.u32 4294901760, %v56_v0  ;;  %v124_v4 = vand.u32 4294901760, %v57_v1  ;;  %v41_v5 = vld [vmem:[#allocation5 + $0x8] sm:$0xff]  ;;  %v58_v7 = vld [vmem:[#allocation5 + $0x90] sm:$0xff]  ;;  %s941_s6 = sshll.u32 %s1434_s1, 4  ;;  %s942_s6 = int_to_ptr.vmem [resolvable:$true] %s941_s6 }
  0x28   :  { %v73_v6 = vand.u32 4294901760, %v40_v2  ;;  %v59_v8 = vld [vmem:[#allocation5 + $0x98] sm:$0xff]  ;;  %v76_v9 = vand.u32 4294901760, %v41_v5  ;;  %v127_v10 = vand.u32 4294901760, %v58_v7  ;;  %v42_v12 = vld [vmem:[#allocation5 + $0x10] sm:$0xff]  ;;  %v60_v18 = vld [vmem:[#allocation5 + $0xa0] sm:$0xff]  ;;  %p1407_p3 = scmp.lt.s32.totalorder %s942_s6, %s942_s6 }
  0x29   :  { %v130_v11 = vand.u32 4294901760, %v59_v8  ;;  %v43_v13 = vld [vmem:[#allocation5 + $0x18] sm:$0xff]  ;;  %v1481_v14 = vpack.c.bf16 %v124_v4, %v121_v3  ;;  %v79_v16 = vand.u32 4294901760, %v42_v12  ;;  %v61_v19 = vld [vmem:[#allocation5 + $0xa8] sm:$0xff]  ;;  %v44_v23 = vld [vmem:[#allocation5 + $0x20] sm:$0xff]  ;;  %v133_v29 = vand.u32 4294901760, %v60_v18 }
  0x2a   :  { %v1483_v15 = vsub.f32 %v40_v2, %v73_v6  ;;  %v82_v17 = vand.u32 4294901760, %v43_v13  ;;  %v1485_v20 = vpack.c.bf16 %v76_v9, %v73_v6  ;;  %v1487_v21 = vsub.f32 %v41_v5, %v76_v9  ;;  %v45_v24 = vld [vmem:[#allocation5 + $0x28] sm:$0xff]  ;;  %v62_v37 = vld [vmem:[#allocation5 + $0xb0] sm:$0xff]  ;;  %v63_v42 = vld [vmem:[#allocation5 + $0xb8] sm:$0xff]  ;;  %s1402_s7 = scalar_lea.vmem %s942_s6, 128 }
  0x2b   :  { %v1489_v22 = vpack.c.bf16 %v130_v11, %v127_v10  ;;  %1162 = vmatprep.subr.bf16.mxu0 %v1481_v14  ;;  %v1492_v25 = vsub.f32 %v58_v7, %v127_v10  ;;  %v1494_v26 = vsub.f32 %v59_v8, %v130_v11  ;;  %v1498_v28 = vsub.f32 %v42_v12, %v79_v16  ;;  %v46_v55 = vld [vmem:[#allocation5 + $0x30] sm:$0xff]  ;;  %v47_v56 = vld [vmem:[#allocation5 + $0x38] sm:$0xff]  ;;  %v64_v5 = vld [vmem:[#allocation5 + $0xc0] sm:$0xff]  ;;  %p1403_p2 = scmp.ne.s32.totalorder %s942_s6, %s1402_s7  ;;  %p1408_p4 = scmp.lt.s32.totalorder %s1402_s7, %s1402_s7 }
  0x2c   :  { %v1496_v27 = vpack.c.bf16 %v82_v17, %v79_v16  ;;  %1164 = vmatpush3.bf16.msra.mxu0 %v1485_v20  ;;  %v136_v30 = vand.u32 4294901760, %v61_v19  ;;  %v1501_v31 = vsub.f32 %v56_v0, %v121_v3  ;;  %v1503_v32 = vsub.f32 %v57_v1, %v124_v4  ;;  %v65_v6 = vld [vmem:[#allocation5 + $0xc8] sm:$0xff]  ;;  %v48_v11 = vld [vmem:[#allocation5 + $0x40] sm:$0xff] }
  0x2d   :  { %1166 = vmatprep.subr.bf16.mxu0 %v1489_v22  ;;  %v85_v33 = vand.u32 4294901760, %v44_v23  ;;  %v88_v34 = vand.u32 4294901760, %v45_v24  ;;  %v1909_v35 = vand.u32 4294901760, %v1483_v15  ;;  %v1908_v36 = vand.u32 4294901760, %v1487_v21  ;;  %p1409_p5 = por %p1408_p4, %p1407_p3 }
  0x2e   :  { %v1508_v38 = vsub.f32 %v43_v13, %v82_v17  ;;  %v1510_v39 = vpack.c.bf16 %v136_v30, %v133_v29  ;;  %v1512_v40 = vsub.f32 %v60_v18, %v133_v29  ;;  %v1913_v41 = vand.u32 4294901760, %v1501_v31  ;;  %v49_v29 = vld [vmem:[#allocation5 + $0x48] sm:$0xff] }
  0x2f   :  { %v1515_v43 = vsub.f32 %v61_v19, %v136_v30  ;;  %v1911_v44 = vand.u32 4294901760, %v1503_v32  ;;  %v1518_v45 = vpack.c.bf16 %v88_v34, %v85_v33  ;;  %v1520_v46 = vsub.f32 %v44_v23, %v85_v33  ;;  %p1410_p6 = pnand %p1409_p5, %p1403_p2 }
  0x30   :  { %1168 = vmatpush3.bf16.msra.mxu0 %v1496_v27  ;;  %v300_v47 = vsub.f32 %v1501_v31, %v1913_v41  ;;  %v188_v48 = vsub.f32 %v1483_v15, %v1909_v35  ;;  %v195_v49 = vsub.f32 %v1487_v21, %v1908_v36  ;;  %v139_v50 = vand.u32 4294901760, %v62_v37  ;;  %v39_v41 = vld [vmem:[#allocation2 + $0x8] sm:$0xff] }
  0x31   :  { %1170 = vmatprep.subr.bf16.mxu0 %v1510_v39  ;;  %v307_v51 = vsub.f32 %v1503_v32, %v1911_v44  ;;  %v142_v52 = vand.u32 4294901760, %v63_v42  ;;  %v1906_v53 = vand.u32 4294901760, %v1492_v25  ;;  %v1904_v54 = vand.u32 4294901760, %v1494_v26 }
  0x32   :  { %v301_v57 = vand.u32 4294901760, %v300_v47  ;;  %v1538_v58 = vsub.f32 %v45_v24, %v88_v34  ;;  %v189_v59 = vand.u32 4294901760, %v188_v48  ;;  %v196_v60 = vand.u32 4294901760, %v195_v49 }
  0x33   :  { %v308_v61 = vand.u32 4294901760, %v307_v51  ;;  %v1540_v62 = vpack.c.bf16 %v142_v52, %v139_v50  ;;  %v1542_v63 = vsub.f32 %v62_v37, %v139_v50  ;;  %v314_v0 = vsub.f32 %v1492_v25, %v1906_v53 }
  0x34   :  { %1172 = vmatpush3.bf16.msra.mxu0 %v1518_v45  ;;  %v1195_v1 = vpack.c.bf16 %v196_v60, %v189_v59  ;;  %v321_v2 = vsub.f32 %v1494_v26, %v1904_v54  ;;  %v91_v3 = vand.u32 4294901760, %v46_v55  ;;  %v94_v4 = vand.u32 4294901760, %v47_v56  ;;  %v67_v59 = vld [vmem:[#allocation5 + $0xd8] sm:$0xff] }
  0x35   :  { %v1193_v7 = vpack.c.bf16 %v308_v61, %v301_v57  ;;  %1174 = vmatprep.subr.bf16.mxu0 %v1540_v62  ;;  %v315_v8 = vand.u32 4294901760, %v314_v0  ;;  %v1903_v9 = vand.u32 4294901760, %v1498_v28  ;;  %v1901_v10 = vand.u32 4294901760, %v1508_v38  ;;  %v66_v57 = vld [vmem:[#allocation5 + $0xd0] sm:$0xff]  ;;  %v71_v54 = vld [vmem:[#allocation5 + $0xf8] sm:$0xff] }
  0x36   :  { %v1554_v12 = vsub.f32 %v63_v42, %v142_v52  ;;  %v322_v13 = vand.u32 4294901760, %v321_v2  ;;  %v1556_v16 = vpack.c.bf16 %v94_v4, %v91_v3  ;;  %v1558_v17 = vsub.f32 %v46_v55, %v91_v3 }
  0x37   :  { %1194 = vmatprep.subr.bf16.mxu1 %v1193_v7  ;;  %v202_v18 = vsub.f32 %v1498_v28, %v1903_v9  ;;  %v209_v19 = vsub.f32 %v1508_v38, %v1901_v10  ;;  %v145_v23 = vand.u32 4294901760, %v64_v5  ;;  %v148_v24 = vand.u32 4294901760, %v65_v6  ;;  %v70_v9 = vld [vmem:[#allocation5 + $0xf0] sm:$0xff] }
  0x38   :  { %1196 = vmatpush3.bf16.msra.mxu1 %v1195_v1  ;;  %v1197_v30 = vpack.c.bf16 %v322_v13, %v315_v8  ;;  %1176 = vmatpush3.bf16.msra.mxu0 %v1556_v16  ;;  %v1899_v33 = vand.u32 4294901760, %v1512_v40  ;;  %v1898_v34 = vand.u32 4294901760, %v1515_v43  ;;  %v97_v37 = vand.u32 4294901760, %v48_v11  ;;  %v50_v1 = vld [vmem:[#allocation5 + $0x50] sm:$0xff] }
  0x39   :  { %v1569_v42 = vsub.f32 %v47_v56, %v94_v4  ;;  %v203_v47 = vand.u32 4294901760, %v202_v18  ;;  %v210_v48 = vand.u32 4294901760, %v209_v19  ;;  %v1571_v49 = vpack.c.bf16 %v148_v24, %v145_v23  ;;  %v51_v18 = vld [vmem:[#allocation5 + $0x58] sm:$0xff] }
  0x3a   :  { %1198 = vmatprep.subr.bf16.mxu1 %v1197_v30  ;;  %v1573_v50 = vsub.f32 %v64_v5, %v145_v23  ;;  %v328_v51 = vsub.f32 %v1512_v40, %v1899_v33  ;;  %v335_v52 = vsub.f32 %v1515_v43, %v1898_v34  ;;  %v100_v55 = vand.u32 4294901760, %v49_v29 }
  0x3b   :  { %v1199_v56 = vpack.c.bf16 %v210_v48, %v203_v47  ;;  %1178 = vmatprep.subr.bf16.mxu0 %v1571_v49  ;;  %v1582_v60 = vsub.f32 %v65_v6, %v148_v24  ;;  %v1896_v61 = vand.u32 4294901760, %v1520_v46  ;;  %v1894_v0 = vand.u32 4294901760, %v1538_v58 }
  0x3c   :  { %v329_v2 = vand.u32 4294901760, %v328_v51  ;;  %v336_v3 = vand.u32 4294901760, %v335_v52  ;;  %v1586_v4 = vpack.c.bf16 %v100_v55, %v97_v37  ;;  %v1588_v5 = vsub.f32 %v48_v11, %v97_v37 }
  0x3d   :  { %1200 = vmatpush3.bf16.msra.mxu1 %v1199_v56  ;;  %v216_v7 = vsub.f32 %v1520_v46, %v1896_v61  ;;  %v223_v6 = vsub.f32 %v1538_v58, %v1894_v0  ;;  %v151_v8 = vand.u32 4294901760, %v66_v57  ;;  %v154_v13 = vand.u32 4294901760, %v67_v59  ;;  %v69_v0 = vld [vmem:[#allocation5 + $0xe8] sm:$0xff] }
  0x3e   :  { %v1201_v19 = vpack.c.bf16 %v336_v3, %v329_v2  ;;  %1180 = vmatpush3.bf16.msra.mxu0 %v1586_v4  ;;  %v1895_v23 = vand.u32 4294901760, %v1542_v63  ;;  %v1897_v11 = vand.u32 4294901760, %v1554_v12  ;;  %v103_v24 = vand.u32 4294901760, %v50_v1  ;;  %v68_v3 = vld [vmem:[#allocation5 + $0xe0] sm:$0xff] }
  0x3f   :  { %v1599_v30 = vsub.f32 %v49_v29, %v100_v55  ;;  %v217_v37 = vand.u32 4294901760, %v216_v7  ;;  %v224_v47 = vand.u32 4294901760, %v223_v6  ;;  %v1601_v48 = vpack.c.bf16 %v154_v13, %v151_v8  ;;  %v52_v6 = vld [vmem:[#allocation5 + $0x60] sm:$0xff] }
  0x40   :  { %1202 = vmatprep.subr.bf16.mxu1 %v1201_v19  ;;  %v1603_v51 = vsub.f32 %v66_v57, %v151_v8  ;;  %v342_v52 = vsub.f32 %v1542_v63, %v1895_v23  ;;  %v349_v56 = vsub.f32 %v1554_v12, %v1897_v11  ;;  %v106_v2 = vand.u32 4294901760, %v51_v18  ;;  %v53_v11 = vld [vmem:[#allocation5 + $0x68] sm:$0xff] }
  0x41   :  { %v1203_v29 = vpack.c.bf16 %v224_v47, %v217_v37  ;;  %1182 = vmatprep.subr.bf16.mxu0 %v1601_v48  ;;  %v1612_v55 = vsub.f32 %v67_v59, %v154_v13  ;;  %v1900_v7 = vand.u32 4294901760, %v1558_v17  ;;  %v1902_v57 = vand.u32 4294901760, %v1569_v42 }
  0x42   :  { %v343_v8 = vand.u32 4294901760, %v342_v52  ;;  %v350_v19 = vand.u32 4294901760, %v349_v56  ;;  %v1616_v23 = vpack.c.bf16 %v106_v2, %v103_v24  ;;  %v1618_v61 = vsub.f32 %v50_v1, %v103_v24 }
  0x43   :  { %1204 = vmatpush3.bf16.msra.mxu1 %v1203_v29  ;;  %v230_v37 = vsub.f32 %v1558_v17, %v1900_v7  ;;  %v237_v59 = vsub.f32 %v1569_v42, %v1902_v57  ;;  %v157_v13 = vand.u32 4294901760, %v68_v3  ;;  %v160_v47 = vand.u32 4294901760, %v69_v0 }
  0x44   :  { %1939 = vst [vmem:[#allocation11_spill] sm:$0xff] %v1616_v23  ;;  %v1205_v34 = vpack.c.bf16 %v350_v19, %v343_v8  ;;  %1184 = vmatpush3.bf16.msra.mxu0 %v1616_v23  ;;  %v1905_v52 = vand.u32 4294901760, %v1573_v50  ;;  %v1907_v1 = vand.u32 4294901760, %v1582_v60  ;;  %v109_v24 = vand.u32 4294901760, %v52_v6 }
  0x45   :  { %v1629_v56 = vsub.f32 %v51_v18, %v106_v2  ;;  %v231_v29 = vand.u32 4294901760, %v230_v37  ;;  %v238_v33 = vand.u32 4294901760, %v237_v59  ;;  %v1631_v7 = vpack.c.bf16 %v160_v47, %v157_v13  ;;  %v54_v37 = vld [vmem:[#allocation5 + $0x70] sm:$0xff] }
  0x46   :  { %1206 = vmatprep.subr.bf16.mxu1 %v1205_v34  ;;  %v1633_v10 = vsub.f32 %v68_v3, %v157_v13  ;;  %v356_v8 = vsub.f32 %v1573_v50, %v1905_v52  ;;  %v363_v19 = vsub.f32 %v1582_v60, %v1907_v1  ;;  %v112_v57 = vand.u32 4294901760, %v53_v11  ;;  %v55_v1 = vld [vmem:[#allocation5 + $0x78] sm:$0xff] }
  0x47   :  { %1940 = vst [vmem:[#allocation12_spill] sm:$0xff] %v1631_v7  ;;  %v1207_v18 = vpack.c.bf16 %v238_v33, %v231_v29  ;;  %1186 = vmatprep.subr.bf16.mxu0 %v1631_v7  ;;  %v1642_v2 = vsub.f32 %v69_v0, %v160_v47  ;;  %v1910_v34 = vand.u32 4294901760, %v1588_v5  ;;  %v1912_v3 = vand.u32 4294901760, %v1599_v30 }
  0x48   :  { %v357_v59 = vand.u32 4294901760, %v356_v8  ;;  %v364_v13 = vand.u32 4294901760, %v363_v19  ;;  %v1646_v52 = vpack.c.bf16 %v112_v57, %v109_v24  ;;  %v1648_v53 = vsub.f32 %v52_v6, %v109_v24 }
  0x49   :  { %1208 = vmatpush3.bf16.msra.mxu1 %v1207_v18  ;;  %v244_v33 = vsub.f32 %v1588_v5, %v1910_v34  ;;  %v251_v0 = vsub.f32 %v1599_v30, %v1912_v3  ;;  %v163_v47 = vand.u32 4294901760, %v70_v9  ;;  %v166_v29 = vand.u32 4294901760, %v71_v54 }
  0x4a   :  { %1941 = vst [vmem:[#allocation13_spill] sm:$0xff] %v1646_v52  ;;  %v1209_v36 = vpack.c.bf16 %v364_v13, %v357_v59  ;;  %1188 = vmatpush3.bf16.msra.mxu0 %v1646_v52  ;;  %v1916_v8 = vand.u32 4294901760, %v1603_v51  ;;  %v1917_v6 = vand.u32 4294901760, %v1612_v55  ;;  %v115_v24 = vand.u32 4294901760, %v54_v37 }
  0x4b   :  { %v1659_v19 = vsub.f32 %v53_v11, %v112_v57  ;;  %v245_v18 = vand.u32 4294901760, %v244_v33  ;;  %v252_v35 = vand.u32 4294901760, %v251_v0  ;;  %v1661_v34 = vpack.c.bf16 %v166_v29, %v163_v47 }
  0x4c   :  { %1210 = vmatprep.subr.bf16.mxu1 %v1209_v36  ;;  %v1663_v44 = vsub.f32 %v70_v9, %v163_v47  ;;  %v370_v59 = vsub.f32 %v1603_v51, %v1916_v8  ;;  %v377_v13 = vsub.f32 %v1612_v55, %v1917_v6  ;;  %v118_v3 = vand.u32 4294901760, %v55_v1  ;;  %v38_v9 = vld [vmem:[#allocation2] sm:$0xff] }
  0x4d   :  { %1942 = vst [vmem:[#allocation14_spill] sm:$0xff] %v1661_v34  ;;  %v1211_v52 = vpack.c.bf16 %v252_v35, %v245_v18  ;;  %1190 = vmatprep.subr.bf16.mxu0 %v1661_v34  ;;  %v1672_v11 = vsub.f32 %v71_v54, %v166_v29  ;;  %v1918_v57 = vand.u32 4294901760, %v1618_v61  ;;  %v1919_v36 = vand.u32 4294901760, %v1629_v56 }
  0x4e   :  { %v371_v33 = vand.u32 4294901760, %v370_v59  ;;  %v378_v0 = vand.u32 4294901760, %v377_v13  ;;  %v1676_v47 = vpack.c.bf16 %v118_v3, %v115_v24  ;;  %v1678_v8 = vsub.f32 %v54_v37, %v115_v24 }
  0x4f   :  { %1212 = vmatpush3.bf16.msra.mxu1 %v1211_v52  ;;  %v258_v35 = vsub.f32 %v1618_v61, %v1918_v57  ;;  %v265_v54 = vsub.f32 %v1629_v56, %v1919_v36  ;;  %v1686_v29 = vand.u32 4294901760, %v39_v41  ;;  %v1922_v18 = vand.u32 4294901760, %v1633_v10 }
  0x50   :  { %1943 = vst [vmem:[#allocation15_spill] sm:$0xff] %v1676_v47  ;;  %v1213_v6 = vpack.c.bf16 %v378_v0, %v371_v33  ;;  %1192 = vmatpush3.bf16.msra.mxu0 %v1676_v47  ;;  %v1928_v59 = vand.u32 4294901760, %v1642_v2  ;;  %v1225_v52 = vpack.c.bf16 %v1503_v32, %v1501_v31  ;;  %v1693_v37 = vand.u32 4294901760, %v38_v9 }
  0x51   :  { %1944 = vst [vmem:[#allocation16_spill] sm:$0xff] %v1686_v29  ;;  %v259_v24 = vand.u32 4294901760, %v258_v35  ;;  %v266_v13 = vand.u32 4294901760, %v265_v54  ;;  %v1696_v57 = vsub.f32 %v39_v41, %v1686_v29  ;;  %v384_v36 = vsub.f32 %v1633_v10, %v1922_v18  ;;  %409 = vmatprep.mubr.f32.mxu1 %v1686_v29 }
  0x52   :  { %1214 = vmatprep.subr.bf16.mxu1 %v1213_v6  ;;  %v391_v33 = vsub.f32 %v1642_v2, %v1928_v59  ;;  %1226 = vmatprep.subr.bf16.mxu0 %v1225_v52  ;;  %v1706_v0 = vsub.f32 %v38_v9, %v1693_v37  ;;  %v1927_v35 = vand.u32 4294901760, %v1648_v53  ;;  %v1929_v41 = vand.u32 4294901760, %v1659_v19 }
  0x53   :  { %v1710_v54 = vsub.f32 %v55_v1, %v118_v3  ;;  %v1215_v47 = vpack.c.bf16 %v266_v13, %v259_v24  ;;  %v1930_v18 = vand.u32 4294901760, %v1696_v57  ;;  %v385_v34 = vand.u32 4294901760, %v384_v36 }
  0x54   :  { %v392_v29 = vand.u32 4294901760, %v391_v33  ;;  %v176_v6 = vand.u32 4294901760, %v1706_v0  ;;  %v272_v52 = vsub.f32 %v1648_v53, %v1927_v35  ;;  %v279_v9 = vsub.f32 %v1659_v19, %v1929_v41 }
  0x55   :  { %1216 = vmatpush3.bf16.msra.mxu1 %v1215_v47  ;;  %v171_v1 = vsub.f32 %v1696_v57, %v1930_v18  ;;  %v1227_v3 = vpack.c.bf16 %v1487_v21, %v1483_v15  ;;  %v1935_v36 = vand.u32 4294901760, %v1663_v44  ;;  %v1938_v24 = vand.u32 4294901760, %v1672_v11 }
  0x56   :  { %v1217_v13 = vpack.c.bf16 %v392_v29, %v385_v34  ;;  %v177_v33 = vsub.f32 %v1706_v0, %v176_v6  ;;  %v273_v35 = vand.u32 4294901760, %v272_v52  ;;  %v280_v59 = vand.u32 4294901760, %v279_v9 }
  0x57   :  { %v172_v41 = vand.u32 4294901760, %v171_v1  ;;  %v398_v47 = vsub.f32 %v1663_v44, %v1935_v36  ;;  %v405_v18 = vsub.f32 %v1672_v11, %v1938_v24  ;;  %v1937_v7 = vand.u32 4294901760, %v1678_v8 }
  0x58   :  { %1218 = vmatprep.subr.bf16.mxu1 %v1217_v13  ;;  %v178_v23 = vand.u32 4294901760, %v177_v33  ;;  %v1219_v34 = vpack.c.bf16 %v280_v59, %v273_v35  ;;  %v1229_v29 = vpack.c.bf16 %v1494_v26, %v1492_v25  ;;  %v1936_v52 = vand.u32 4294901760, %v1710_v54 }
  0x59   :  { %173 = vmatprep.mubr.f32.mxu0 %v172_v41  ;;  %v399_v9 = vand.u32 4294901760, %v398_v47  ;;  %v406_v1 = vand.u32 4294901760, %v405_v18  ;;  %v286_v36 = vsub.f32 %v1678_v8, %v1937_v7  ;;  %v1231_v33 = vpack.c.bf16 %v1508_v38, %v1498_v28 }
  0x5a   :  { %179 = vmatmul.mubr.f32.vlgmr.msra.gmra.mrb[0].mxu0 %v178_v23  ;;  %1220 = vmatpush3.bf16.msra.mxu1 %v1219_v34  ;;  %v293_v13 = vsub.f32 %v1710_v54, %v1936_v52  ;;  %v1233_v41 = vpack.c.bf16 %v1515_v43, %v1512_v40  ;;  %v1235_v23 = vpack.c.bf16 %v1538_v58, %v1520_v46  ;;  %v1946_v34 = vand.u32 4294901760, %v1503_v32 }
  0x5b   :  { %1228 = vmatpush3.bf16.msra.mxu0 %v1227_v3  ;;  %v1221_v59 = vpack.c.bf16 %v406_v1, %v399_v9  ;;  %v287_v35 = vand.u32 4294901760, %v286_v36  ;;  %546 = vmatprep.mubr.f32.mxu0 %v1696_v57  ;;  %v1237_v47 = vpack.c.bf16 %v1554_v12, %v1542_v63  ;;  %v1945_v36 = vand.u32 4294901760, %v1501_v31 }
  0x5c   :  { %1230 = vmatprep.subr.bf16.mxu0 %v1229_v29  ;;  %v294_v18 = vand.u32 4294901760, %v293_v13  ;;  %v1947_v1 = vand.u32 4294901760, %v1483_v15  ;;  %v1948_v29 = vand.u32 4294901760, %v1487_v21  ;;  %v1949_v52 = vand.u32 4294901760, %v1492_v25 }
  0x5d   :  { %1222 = vmatprep.subr.bf16.mxu1 %v1221_v59  ;;  %v1289_v9 = vpack.c.bf16 %v1946_v34, %v1945_v36  ;;  %v1950_v59 = vand.u32 4294901760, %v1494_v26  ;;  %v1951_v24 = vand.u32 4294901760, %v1498_v28  ;;  %v1953_v31 = vand.u32 4294901760, %v1512_v40 }
  0x5e   :  { %v1223_v3 = vpack.c.bf16 %v294_v18, %v287_v35  ;;  %v1291_v13 = vpack.c.bf16 %v1948_v29, %v1947_v1  ;;  %v1952_v35 = vand.u32 4294901760, %v1508_v38  ;;  %v1954_v32 = vand.u32 4294901760, %v1515_v43  ;;  %v1969_v29 = vld [vmem:[#allocation13_spill] sm:$0xff] }
  0x5f   :  { %v1293_v7 = vpack.c.bf16 %v1950_v59, %v1949_v52  ;;  %1232 = vmatpush3.bf16.msra.mxu0 %v1231_v33  ;;  %v1955_v15 = vand.u32 4294901760, %v1520_v46  ;;  %v1956_v21 = vand.u32 4294901760, %v1538_v58  ;;  %v1957_v25 = vand.u32 4294901760, %v1542_v63  ;;  %v1970_v59 = vld [vmem:[#allocation14_spill] sm:$0xff] }
  0x60   :  { %v1295_v18 = vpack.c.bf16 %v1952_v35, %v1951_v24  ;;  %v1297_v36 = vpack.c.bf16 %v1954_v32, %v1953_v31  ;;  %v1958_v26 = vand.u32 4294901760, %v1554_v12  ;;  %1224 = vmatpush3.bf16.msra.mxu1 %v1223_v3  ;;  %1234 = vmatprep.subr.bf16.mxu0 %v1233_v41  ;;  %v1959_v28 = vand.u32 4294901760, %v1558_v17  ;;  %v1971_v35 = vld [vmem:[#allocation15_spill] sm:$0xff] }
  0x61   :  { %v1299_v34 = vpack.c.bf16 %v1956_v21, %v1955_v15  ;;  %v1960_v38 = vand.u32 4294901760, %v1569_v42  ;;  %v1961_v43 = vand.u32 4294901760, %v1573_v50  ;;  %v1962_v24 = vand.u32 4294901760, %v1582_v60  ;;  %1258 = vmatprep.subr.bf16.mxu1 %v1481_v14 }
  0x62   :  { %v1301_v52 = vpack.c.bf16 %v1958_v26, %v1957_v25  ;;  %v1963_v58 = vand.u32 4294901760, %v1588_v5  ;;  %v1964_v33 = vand.u32 4294901760, %v1599_v30  ;;  %v1239_v12 = vpack.c.bf16 %v1569_v42, %v1558_v17 }
  0x63   :  { %v1303_v40 = vpack.c.bf16 %v1960_v38, %v1959_v28  ;;  %v1305_v46 = vpack.c.bf16 %v1962_v24, %v1961_v43  ;;  %411 = vmatmul.mubr.f32.vlgmr.msra.gmra.mrb[0].mxu1 %v1693_v37  ;;  %1236 = vmatpush3.bf16.msra.mxu0 %v1235_v23  ;;  %v1241_v41 = vpack.c.bf16 %v1582_v60, %v1573_v50  ;;  %v1965_v3 = vand.u32 4294901760, %v1696_v57  ;;  %v1966_v57 = vld [vmem:[#allocation11_spill] sm:$0xff]  ;;  %v1967_v23 = vld [vmem:[#allocation12_spill] sm:$0xff] }
  0x64   :  { %v1307_v63 = vpack.c.bf16 %v1964_v33, %v1963_v58  ;;  %1260 = vmatpush3.bf16.msra.mxu1 %v1485_v20  ;;  %1238 = vmatprep.subr.bf16.mxu0 %v1237_v47  ;;  %v1243_v1 = vpack.c.bf16 %v1599_v30, %v1588_v5  ;;  %v1245_v17 = vpack.c.bf16 %v1612_v55, %v1603_v51  ;;  %v1968_v47 = vld [vmem:[#allocation16_spill] sm:$0xff] }
  0x65   :  { %1262 = vmatprep.subr.bf16.mxu1 %v1489_v22  ;;  %653 = vmatprep.mubr.f32.mxu1 %v1965_v3  ;;  %v1247_v42 = vpack.c.bf16 %v1629_v56, %v1618_v61  ;;  %v1249_v50 = vpack.c.bf16 %v1642_v2, %v1633_v10  ;;  %v1251_v60 = vpack.c.bf16 %v1659_v19, %v1648_v53 }
  0x66   :  { %v1253_v5 = vpack.c.bf16 %v1672_v11, %v1663_v44  ;;  %v1255_v30 = vpack.c.bf16 %v1710_v54, %v1678_v8 }
  0x67   :  { %1240 = vmatpush3.bf16.msra.mxu0 %v1239_v12 }
  0x68   :  { %1264 = vmatpush3.bf16.msra.mxu1 %v1496_v27  ;;  %1242 = vmatprep.subr.bf16.mxu0 %v1241_v41 }
  0x69   :  { %1266 = vmatprep.subr.bf16.mxu1 %v1510_v39 }
  0x6b   :  { %1244 = vmatpush3.bf16.msra.mxu0 %v1243_v1 }
  0x6c   :  { %1268 = vmatpush3.bf16.msra.mxu1 %v1518_v45  ;;  %1246 = vmatprep.subr.bf16.mxu0 %v1245_v17 }
  0x6d   :  { %1270 = vmatprep.subr.bf16.mxu1 %v1540_v62 }
  0x6f   :  { %1248 = vmatpush3.bf16.msra.mxu0 %v1247_v42 }
  0x70   :  { %1272 = vmatpush3.bf16.msra.mxu1 %v1556_v16  ;;  %1250 = vmatprep.subr.bf16.mxu0 %v1249_v50 }
  0x71   :  { %1274 = vmatprep.subr.bf16.mxu1 %v1571_v49 }
  0x73   :  { %1252 = vmatpush3.bf16.msra.mxu0 %v1251_v60 }
  0x74   :  { %1276 = vmatpush3.bf16.msra.mxu1 %v1586_v4  ;;  %1254 = vmatprep.subr.bf16.mxu0 %v1253_v5 }
  0x75   :  { %1278 = vmatprep.subr.bf16.mxu1 %v1601_v48 }
  0x77   :  { %1256 = vmatpush3.bf16.msra.mxu0 %v1255_v30 }
  0x78   :  { %1280 = vmatpush3.bf16.msra.mxu1 %v1966_v57  ;;  %1290 = vmatprep.subr.bf16.mxu0 %v1289_v9  ;;  %v1973_v9 = vand.u32 4294901760, %v1612_v55 }
  0x79   :  { %1282 = vmatprep.subr.bf16.mxu1 %v1967_v23 }
  0x7a   :  { %549 = vmatmul.mubr.f32.vlgmr.msra.gmra.mrb[2].mxu0 %v1706_v0  ;;  %v1974_v0 = vand.u32 4294901760, %v1618_v61  ;;  %v1980_v61 = vand.u32 4294901760, %v1663_v44 }
  0x7b   :  { %1292 = vmatpush3.bf16.msra.mxu0 %v1291_v13  ;;  %823 = vmatprep.mubr.f32.mxu0 %v1968_v47 }
  0x7c   :  { %1284 = vmatpush3.bf16.msra.mxu1 %v1969_v29  ;;  %1294 = vmatprep.subr.bf16.mxu0 %v1293_v7  ;;  %v1972_v7 = vand.u32 4294901760, %v1603_v51  ;;  %v1978_v51 = vand.u32 4294901760, %v1648_v53 }
  0x7d   :  { %1286 = vmatprep.subr.bf16.mxu1 %v1970_v59 }
  0x7f   :  { %1296 = vmatpush3.bf16.msra.mxu0 %v1295_v18 }
  0x80   :  { %1288 = vmatpush3.bf16.msra.mxu1 %v1971_v35  ;;  %1298 = vmatprep.subr.bf16.mxu0 %v1297_v36 }
  0x81   :  { %1322 = vmatprep.subr.bf16.mxu1 %v1481_v14  ;;  %v1309_v14 = vpack.c.bf16 %v1973_v9, %v1972_v7 }
  0x83   :  { %657 = vmatmul.mubr.f32.vlgmr.msra.gmra.mrb[2].mxu1 %v176_v6  ;;  %1300 = vmatpush3.bf16.msra.mxu0 %v1299_v34 }
  0x84   :  { %1324 = vmatpush3.bf16.msra.mxu1 %v1485_v20  ;;  %1302 = vmatprep.subr.bf16.mxu0 %v1301_v52  ;;  %v1975_v20 = vand.u32 4294901760, %v1629_v56 }
  0x85   :  { %1326 = vmatprep.subr.bf16.mxu1 %v1489_v22  ;;  %927 = vmatprep.mubr.f32.mxu1 %v1968_v47  ;;  %v1976_v22 = vand.u32 4294901760, %v1633_v10  ;;  %v1982_v10 = vand.u32 4294901760, %v1678_v8 }
  0x86   :  { %v1311_v6 = vpack.c.bf16 %v1975_v20, %v1974_v0 }
  0x87   :  { %1304 = vmatpush3.bf16.msra.mxu0 %v1303_v40 }
  0x88   :  { %1328 = vmatpush3.bf16.msra.mxu1 %v1496_v27  ;;  %1306 = vmatprep.subr.bf16.mxu0 %v1305_v46  ;;  %v1977_v27 = vand.u32 4294901760, %v1642_v2 }
  0x89   :  { %1330 = vmatprep.subr.bf16.mxu1 %v1510_v39  ;;  %v1979_v39 = vand.u32 4294901760, %v1659_v19 }
  0x8a   :  { %v1313_v13 = vpack.c.bf16 %v1977_v27, %v1976_v22 }
  0x8b   :  { %1308 = vmatpush3.bf16.msra.mxu0 %v1307_v63  ;;  %v1315_v55 = vpack.c.bf16 %v1979_v39, %v1978_v51 }
  0x8c   :  { %1332 = vmatpush3.bf16.msra.mxu1 %v1518_v45  ;;  %1310 = vmatprep.subr.bf16.mxu0 %v1309_v14  ;;  %v1981_v45 = vand.u32 4294901760, %v1672_v11 }
  0x8d   :  { %1334 = vmatprep.subr.bf16.mxu1 %v1540_v62  ;;  %v1983_v62 = vand.u32 4294901760, %v1710_v54 }
  0x8e   :  { %v1317_v56 = vpack.c.bf16 %v1981_v45, %v1980_v61 }
  0x8f   :  { %1312 = vmatpush3.bf16.msra.mxu0 %v1311_v6  ;;  %v1319_v2 = vpack.c.bf16 %v1983_v62, %v1982_v10 }
  0x90   :  { %1336 = vmatpush3.bf16.msra.mxu1 %v1556_v16  ;;  %1314 = vmatprep.subr.bf16.mxu0 %v1313_v13 }
  0x91   :  { %1338 = vmatprep.subr.bf16.mxu1 %v1571_v49 }
  0x93   :  { %1316 = vmatpush3.bf16.msra.mxu0 %v1315_v55 }
  0x94   :  { %1340 = vmatpush3.bf16.msra.mxu1 %v1586_v4  ;;  %1318 = vmatprep.subr.bf16.mxu0 %v1317_v56 }
  0x95   :  { %1342 = vmatprep.subr.bf16.mxu1 %v1601_v48 }
  0x97   :  { %1320 = vmatpush3.bf16.msra.mxu0 %v1319_v2 }
  0x98   :  { %1344 = vmatpush3.bf16.msra.mxu1 %v1966_v57 }
  0x99   :  { %1346 = vmatprep.subr.bf16.mxu1 %v1967_v23 }
  0x9a   :  { %825 = vmatmul.mubr.f32.vlgmr.msra.gmra.mrb[4].mxu0 %v1693_v37 }
  0x9c   :  { %1348 = vmatpush3.bf16.msra.mxu1 %v1969_v29 }
  0x9d   :  { %1350 = vmatprep.subr.bf16.mxu1 %v1970_v59 }
  0xa0   :  { %1352 = vmatpush3.bf16.msra.mxu1 %v1971_v35 }
  0xa3   :  { %929 = vmatmul.mubr.f32.vlgmr.msra.gmra.mrb[4].mxu1 %v1693_v37 }
 0x12d   :  { %v983_v44 = vpop.f32.mrb[0].mxu0 }
 0x12e   :  { %v984_v53 = vpop.f32.mrb[1].mxu0 }
 0x12f   :  { %v985_v16 = vadd.f32 %v984_v53, %v983_v44 }
 0x136   :  { %v1018_v49 = vpop.f32.mrb[0].mxu1 }
 0x137   :  { %v1019_v4 = vpop.f32.mrb[1].mxu1 }
 0x138   :  { %v1020_v48 = vadd.f32 %v1019_v4, %v1018_v49 }
 0x13a   :  { %v413_v8 = vadd.f32 %v1020_v48, %v985_v16 }
 0x14d   :  { %v1053_v19 = vpop.f32.mrb[2].mxu0 }
 0x14e   :  { %v1054_v11 = vpop.f32.mrb[3].mxu0 }
 0x14f   :  { %v1055_v54 = vadd.f32 %v1054_v11, %v1053_v19 }
 0x151   :  { %v551_v18 = vadd.f32 %v1055_v54, %v413_v8 }
 0x156   :  { %v1088_v31 = vpop.f32.mrb[2].mxu1 }
 0x157   :  { %v1089_v32 = vpop.f32.mrb[3].mxu1 }
 0x158   :  { %v1090_v36 = vadd.f32 %v1089_v32, %v1088_v31 }
 0x15a   :  { %v659_v15 = vadd.f32 %v1090_v36, %v551_v18 }
 0x16d   :  { %v1123_v21 = vpop.f32.mrb[4].mxu0 }
 0x16e   :  { %v1124_v34 = vpop.f32.mrb[5].mxu0 }
 0x16f   :  { %v1125_v25 = vadd.f32 %v1124_v34, %v1123_v21 }
 0x171   :  { %v827_v26 = vadd.f32 %v1125_v25, %v659_v15 }
 0x176   :  { %v1158_v37 = vpop.f32.mrb[4].mxu1 }
 0x177   :  { %v1159_v52 = vpop.f32.mrb[5].mxu1 }
 0x178   :  { %v1160_v28 = vadd.f32 %v1159_v52, %v1158_v37 }
 0x17a   :  { %v931_v38 = vadd.f32 %v1160_v28, %v827_v26 }
 0x17c   :  { %934 = vst [vmem:[#allocation7] sm:$0xff] %v931_v38 }
 0x17d   :  { %1413 = shalt.err (!%p1410_p6)
}
 0x17e   :  { %s1414_s10 = scalar_lea.hbm %s1893_s2, 128 }
 0x17f   :  { %p1415_p7 = scmp.ne.s32.totalorder %s1893_s2, %s1414_s10  ;;  %p1418_p8 = scmp.lt.u32.totalorder %s1414_s10, %s1893_s2 }
 0x181   :  { %p1420_p9 = pnand %p1418_p8, %p1415_p7 }
 0x183   :  { %1423 = shalt.err (!%p1420_p9)
}
 0x184   :  { %944 = dma.vmem_to_hbm [thread:$0]  %s942_s6, 128, %s1893_s2, [#allocation4]  }
 0x185   :  { %1428 = dma.done.wait [#allocation4], 128  }
 0x186   :  { %1429 = vsyncadd [#allocation4], 4294967168 }
 0x187   :  { %948 = vsyncpa [#allocation3], 1 }
 0x188   :  { %949 = vsyncpa [#allocation6], 1 }
 0x189   :  { %950 = vsyncpa [#allocation4], 1 }

// kernel: tpu_custom_call.1
= control target key start
LH: loop header
LB: loop body
LE: loop exit
PB: predicated region body
PF: predicated region fallthrough
CT: control target
= control target key end

     0   :  { %7 = vsyncpa [#allocation3], 0  ;;  %s366_s0 = inlined_call_operand.hbm [shape: f32[8,256], index: 0, kind: input, shape index: {}]   ;;  %s367_s1 = inlined_call_operand.hbm [shape: f32[256,128], index: 1, kind: input, shape index: {}]   ;;  %s368_s2 = inlined_call_operand.hbm [shape: f32[8,128], index: 2, kind: output, shape index: {}]  }
   0x1   :  { %8 = vsyncpa [#allocation6], 0 }
   0x2   :  { %9 = vsyncpa [#allocation4], 0  ;;  %s303_s9 = smov [#allocation2]   ;;  %s304_s11 = smov [#allocation5]  }
   0x3   :  { %s16_s10 = sshll.u32 %s303_s9, 4  ;;  %s25_s12 = sshll.u32 %s304_s11, 4  ;;  %s17_s10 = int_to_ptr.vmem [resolvable:$true] %s16_s10  ;;  %s323_s12 = int_to_ptr.vmem [resolvable:$true] %s25_s12 }
   0x4   :  { %s231_s15 = scalar_lea.hbm %s366_s0, 256 }
   0x5   :  { %p232_p0 = scmp.ne.s32.totalorder %s366_s0, %s231_s15  ;;  %p235_p1 = scmp.lt.u32.totalorder %s231_s15, %s366_s0 }
   0x7   :  { %p237_p2 = pnand %p235_p1, %p232_p0 }
   0x9   :  { %240 = shalt.err (!%p237_p2)
}
   0xa   :  { %s241_s20 = scalar_lea.vmem %s17_s10, 256  ;;  %p246_p4 = scmp.lt.s32.totalorder %s17_s10, %s17_s10 }
   0xb   :  { %p242_p3 = scmp.ne.s32.totalorder %s17_s10, %s241_s20  ;;  %p247_p5 = scmp.lt.s32.totalorder %s241_s20, %s241_s20 }
   0xd   :  { %p248_p6 = por %p247_p5, %p246_p4 }
   0xf   :  { %p249_p7 = pnand %p248_p6, %p242_p3 }
  0x11   :  { %252 = shalt.err (!%p249_p7)
}
  0x12   :  { %19 = dma.hbm_to_vmem [thread:$0]  %s366_s0, 256, %s17_s10, [#allocation3]  }
  0x13   :  { %s253_s25 = scalar_lea.hbm %s367_s1, 4096 }
  0x14   :  { %p254_p8 = scmp.ne.s32.totalorder %s367_s1, %s253_s25  ;;  %p257_p9 = scmp.lt.u32.totalorder %s253_s25, %s367_s1 }
  0x16   :  { %p259_p10 = pnand %p257_p9, %p254_p8 }
  0x18   :  { %262 = shalt.err (!%p259_p10)
}
  0x19   :  { %s263_s30 = scalar_lea.vmem %s323_s12, 4096  ;;  %p268_p12 = scmp.lt.s32.totalorder %s323_s12, %s323_s12 }
  0x1a   :  { %p264_p11 = scmp.ne.s32.totalorder %s323_s12, %s263_s30  ;;  %p269_p13 = scmp.lt.s32.totalorder %s263_s30, %s263_s30 }
  0x1c   :  { %p270_p0 = por %p269_p13, %p268_p12 }
  0x1e   :  { %p271_p1 = pnand %p270_p0, %p264_p11 }
  0x20   :  { %274 = shalt.err (!%p271_p1)
}
  0x21   :  { %s305_s0 = smov 128   ;;  %s306_s3 = smov 8  }
  0x22   :  { %31 = dma.hbm_to_vmem [thread:$0]  %s367_s1, 4096, %s323_s12, [#allocation6], %s305_s0, %s305_s0, %s306_s3  }
  0x23   :  { %297 = dma.done.wait [#allocation3], 256  }
  0x24   :  { %298 = vsyncadd [#allocation3], 4294967040 }
  0x25   :  { %299 = dma.done.wait [#allocation6], 4096  }
  0x26   :  { %300 = vsyncadd [#allocation6], 4294963200  ;;  %v56_v0 = vld [vmem:[#allocation5 + $0x80] sm:$0xff]  ;;  %v57_v1 = vld [vmem:[#allocation5 + $0x88] sm:$0xff]  ;;  %s307_s1 = smov [#allocation7]  }
  0x27   :  { %v40_v2 = vld [vmem:[#allocation5] sm:$0xff]  ;;  %v194_v3 = vpack.c.bf16 %v57_v1, %v56_v0  ;;  %v41_v4 = vld [vmem:[#allocation5 + $0x8] sm:$0xff]  ;;  %v58_v5 = vld [vmem:[#allocation5 + $0x90] sm:$0xff]  ;;  %s149_s6 = sshll.u32 %s307_s1, 4  ;;  %s150_s6 = int_to_ptr.vmem [resolvable:$true] %s149_s6 }
  0x28   :  { %v59_v6 = vld [vmem:[#allocation5 + $0x98] sm:$0xff]  ;;  %v196_v7 = vpack.c.bf16 %v41_v4, %v40_v2  ;;  %v42_v9 = vld [vmem:[#allocation5 + $0x10] sm:$0xff]  ;;  %v60_v11 = vld [vmem:[#allocation5 + $0xa0] sm:$0xff]  ;;  %s275_s7 = scalar_lea.vmem %s150_s6, 128  ;;  %p280_p3 = scmp.lt.s32.totalorder %s150_s6, %s150_s6 }
  0x29   :  { %v198_v8 = vpack.c.bf16 %v59_v6, %v58_v5  ;;  %v43_v10 = vld [vmem:[#allocation5 + $0x18] sm:$0xff]  ;;  %195 = vmatprep.subr.bf16.mxu0 %v194_v3  ;;  %v61_v12 = vld [vmem:[#allocation5 + $0xa8] sm:$0xff]  ;;  %v44_v15 = vld [vmem:[#allocation5 + $0x20] sm:$0xff]  ;;  %p276_p2 = scmp.ne.s32.totalorder %s150_s6, %s275_s7  ;;  %p281_p4 = scmp.lt.s32.totalorder %s275_s7, %s275_s7 }
  0x2a   :  { %197 = vmatpush3.bf16.msra.mxu0 %v196_v7  ;;  %v200_v13 = vpack.c.bf16 %v43_v10, %v42_v9  ;;  %v202_v14 = vpack.c.bf16 %v61_v12, %v60_v11  ;;  %v45_v16 = vld [vmem:[#allocation5 + $0x28] sm:$0xff]  ;;  %v62_v17 = vld [vmem:[#allocation5 + $0xb0] sm:$0xff]  ;;  %v63_v18 = vld [vmem:[#allocation5 + $0xb8] sm:$0xff] }
  0x2b   :  { %199 = vmatprep.subr.bf16.mxu0 %v198_v8  ;;  %v204_v19 = vpack.c.bf16 %v45_v16, %v44_v15  ;;  %v206_v20 = vpack.c.bf16 %v63_v18, %v62_v17  ;;  %v46_v21 = vld [vmem:[#allocation5 + $0x30] sm:$0xff]  ;;  %v47_v22 = vld [vmem:[#allocation5 + $0x38] sm:$0xff]  ;;  %v64_v23 = vld [vmem:[#allocation5 + $0xc0] sm:$0xff]  ;;  %p282_p5 = por %p281_p4, %p280_p3 }
  0x2c   :  { %v65_v24 = vld [vmem:[#allocation5 + $0xc8] sm:$0xff]  ;;  %v39_v25 = vld [vmem:[#allocation2 + $0x8] sm:$0xff]  ;;  %v208_v26 = vpack.c.bf16 %v47_v22, %v46_v21  ;;  %v48_v28 = vld [vmem:[#allocation5 + $0x40] sm:$0xff] }
  0x2d   :  { %136 = vmatprep.mubr.f32.mxu0 %v39_v25  ;;  %v210_v27 = vpack.c.bf16 %v65_v24, %v64_v23  ;;  %v49_v29 = vld [vmem:[#allocation5 + $0x48] sm:$0xff]  ;;  %v66_v30 = vld [vmem:[#allocation5 + $0xd0] sm:$0xff]  ;;  %v67_v31 = vld [vmem:[#allocation5 + $0xd8] sm:$0xff]  ;;  %p283_p6 = pnand %p282_p5, %p276_p2 }
  0x2e   :  { %201 = vmatpush3.bf16.msra.mxu0 %v200_v13  ;;  %v212_v32 = vpack.c.bf16 %v49_v29, %v48_v28  ;;  %v214_v33 = vpack.c.bf16 %v67_v31, %v66_v30  ;;  %v50_v34 = vld [vmem:[#allocation5 + $0x50] sm:$0xff]  ;;  %v51_v35 = vld [vmem:[#allocation5 + $0x58] sm:$0xff]  ;;  %v68_v36 = vld [vmem:[#allocation5 + $0xe0] sm:$0xff] }
  0x2f   :  { %203 = vmatprep.subr.bf16.mxu0 %v202_v14  ;;  %v69_v37 = vld [vmem:[#allocation5 + $0xe8] sm:$0xff]  ;;  %v216_v38 = vpack.c.bf16 %v51_v35, %v50_v34  ;;  %v52_v40 = vld [vmem:[#allocation5 + $0x60] sm:$0xff]  ;;  %v70_v42 = vld [vmem:[#allocation5 + $0xf0] sm:$0xff] }
  0x30   :  { %v218_v39 = vpack.c.bf16 %v69_v37, %v68_v36  ;;  %v53_v41 = vld [vmem:[#allocation5 + $0x68] sm:$0xff]  ;;  %v71_v43 = vld [vmem:[#allocation5 + $0xf8] sm:$0xff]  ;;  %v54_v46 = vld [vmem:[#allocation5 + $0x70] sm:$0xff] }
  0x31   :  { %v220_v44 = vpack.c.bf16 %v53_v41, %v52_v40  ;;  %v222_v45 = vpack.c.bf16 %v71_v43, %v70_v42  ;;  %v55_v47 = vld [vmem:[#allocation5 + $0x78] sm:$0xff]  ;;  %v38_v49 = vld [vmem:[#allocation2] sm:$0xff] }
  0x32   :  { %205 = vmatpush3.bf16.msra.mxu0 %v204_v19  ;;  %v224_v48 = vpack.c.bf16 %v55_v47, %v54_v46 }
  0x33   :  { %207 = vmatprep.subr.bf16.mxu0 %v206_v20 }
  0x36   :  { %209 = vmatpush3.bf16.msra.mxu0 %v208_v26 }
  0x37   :  { %211 = vmatprep.subr.bf16.mxu0 %v210_v27 }
  0x3a   :  { %213 = vmatpush3.bf16.msra.mxu0 %v212_v32 }
  0x3b   :  { %215 = vmatprep.subr.bf16.mxu0 %v214_v33 }
  0x3e   :  { %217 = vmatpush3.bf16.msra.mxu0 %v216_v38 }
  0x3f   :  { %219 = vmatprep.subr.bf16.mxu0 %v218_v39 }
  0x42   :  { %221 = vmatpush3.bf16.msra.mxu0 %v220_v44 }
  0x43   :  { %223 = vmatprep.subr.bf16.mxu0 %v222_v45 }
  0x46   :  { %225 = vmatpush3.bf16.msra.mxu0 %v224_v48 }
  0x49   :  { %137 = vmatmul.mubr.f32.vlgmr.msra.gmra.mrb[0].mxu0 %v38_v49 }
 0x11c   :  { %v191_v50 = vpop.f32.mrb[0].mxu0 }
 0x11d   :  { %v192_v51 = vpop.f32.mrb[1].mxu0 }
 0x11e   :  { %v193_v52 = vadd.f32 %v192_v51, %v191_v50 }
 0x120   :  { %142 = vst [vmem:[#allocation7] sm:$0xff] %v193_v52 }
 0x121   :  { %286 = shalt.err (!%p283_p6)
}
 0x122   :  { %s287_s10 = scalar_lea.hbm %s368_s2, 128 }
 0x123   :  { %p288_p7 = scmp.ne.s32.totalorder %s368_s2, %s287_s10  ;;  %p291_p8 = scmp.lt.u32.totalorder %s287_s10, %s368_s2 }
 0x125   :  { %p293_p9 = pnand %p291_p8, %p288_p7 }
 0x127   :  { %296 = shalt.err (!%p293_p9)
}
 0x128   :  { %152 = dma.vmem_to_hbm [thread:$0]  %s150_s6, 128, %s368_s2, [#allocation4]  }
 0x129   :  { %301 = dma.done.wait [#allocation4], 128  }
 0x12a   :  { %302 = vsyncadd [#allocation4], 4294967168 }
 0x12b   :  { %156 = vsyncpa [#allocation3], 1 }
 0x12c   :  { %157 = vsyncpa [#allocation6], 1 }
 0x12d   :  { %158 = vsyncpa [#allocation4], 1 }

</bundles_post_ra>
